<compile_context>
chip_gen: v6e
topology: v6e:2x2x1
jax: 0.10.0
libtpu: 0.0.40
codegen_flags: <defaults>
</compile_context>

<pallas_src>
import jax
import jax.numpy as jnp
from jax.experimental import pallas as pl
from jax.experimental.pallas import tpu as pltpu

_LANES = 128
_SUBLANES = 8
# Below this many elements a pallas_call is pure overhead; let XLA fuse it.
_MIN_PALLAS_ELEMS = 32 * 1024
# ~1 MiB per input block (per stream, before double buffering).
_TARGET_BLOCK_BYTES = 1 << 20


def _skip_kernel(skip_ref, fa_ref, concat_ref, out_ref):
    # skip_ref lives in SMEM as float32, shape (1,).
    s = skip_ref[0]
    out_ref[...] = (fa_ref[...] + s * concat_ref[...]).astype(out_ref.dtype)


def _choose_layout(n, itemsize):
    """Pick (rows, lane_width, block_rows) for a lane-dense 2-D slab."""
    lane_w = _LANES
    for cand in (2048, 1024, 512, 256):
        if n % cand == 0:
            lane_w = cand
            break
    rows = n // lane_w
    target_rows = max(
        _SUBLANES,
        (_TARGET_BLOCK_BYTES // (itemsize * lane_w)) // _SUBLANES * _SUBLANES,
    )
    if rows <= target_rows:
        # Single block covering all rows; a full-extent block dim is always legal
        # even if not a multiple of 8.
        block_rows = rows
    else:
        # Multiple of 8; the last grid block may be partial (reads of the
        # out-of-bounds region are discarded with the masked writeback, which
        # is safe for a pure elementwise op).
        block_rows = target_rows
    return rows, lane_w, block_rows


def skip_parameter(f_a, concat, skip_value, *, min_pallas_elems=_MIN_PALLAS_ELEMS):
    """f_a + skip_value * concat, elementwise, via a Pallas TPU kernel.

    f_a, concat: arrays of identical shape/dtype (e.g. NCHW activations).
    skip_value:  scalar parameter, shape (1,) (kept float32 in SMEM).
    """
    assert f_a.shape == concat.shape, "SkipParameter expects same-shape inputs"
    orig_shape = f_a.shape
    dtype = f_a.dtype
    n = f_a.size

    s32 = skip_value.reshape(1).astype(jnp.float32)

    # Tiny or non-lane-divisible inputs: plain JAX.  XLA fuses this for free;
    # a kernel launch (or a pad/slice HBM round trip) would only add overhead.
    if n < min_pallas_elems or n % _LANES != 0:
        return (f_a + s32[0] * concat).astype(dtype)

    itemsize = jnp.dtype(dtype).itemsize
    rows, lane_w, block_rows = _choose_layout(n, itemsize)

    # Reshape of contiguous data: no HBM copy.
    fa_2d = f_a.reshape(rows, lane_w)
    cc_2d = concat.reshape(rows, lane_w)

    grid = (pl.cdiv(rows, block_rows),)
    block = (block_rows, lane_w)

    cost = pl.CostEstimate(
        flops=2 * n, transcendentals=0, bytes_accessed=3 * n * itemsize
    )

    out_2d = pl.pallas_call(
        _skip_kernel,
        out_shape=jax.ShapeDtypeStruct((rows, lane_w), dtype),
        grid=grid,
        in_specs=[
            pl.BlockSpec(memory_space=pltpu.SMEM),      # skip_value scalar (f32)
            pl.BlockSpec(block, lambda i: (i, 0)),       # f_a tile
            pl.BlockSpec(block, lambda i: (i, 0)),       # concat tile
        ],
        out_specs=pl.BlockSpec(block, lambda i: (i, 0)),
        compiler_params=pltpu.CompilerParams(
            dimension_semantics=("parallel",)),
        cost_estimate=cost,
    )(s32, fa_2d, cc_2d)

    return out_2d.reshape(orig_shape)


if __name__ == "__main__":
    key = jax.random.PRNGKey(0)
    k1, k2, k3, k4 = jax.random.split(key, 4)

    # Parameter: nn.Parameter(torch.ones(1)) then constant_(0.03)
    skip_value = jnp.full((1,), 0.03, dtype=jnp.float32)

    # --- 1) Small NCHW activations consistent with the module's usage. ---
    x_shape = (2, 4, 16, 16)
    f_a = jax.random.normal(k1, x_shape, dtype=jnp.float32)
    concat = jax.random.normal(k2, x_shape, dtype=jnp.float32)
    ref = f_a + skip_value[0] * concat

    # Force the Pallas path even at this tiny size to exercise the kernel.
    out_kernel = skip_parameter(f_a, concat, skip_value, min_pallas_elems=0)
    out_kernel = jax.block_until_ready(out_kernel)
    assert out_kernel.shape == f_a.shape
    assert jnp.allclose(out_kernel, ref, atol=1e-6, rtol=1e-6)

    # Default path for tiny inputs: fused plain-JAX fallback.
    out_default = jax.block_until_ready(skip_parameter(f_a, concat, skip_value))
    assert jnp.allclose(out_default, ref, atol=1e-6, rtol=1e-6)

    # --- 2) Medium case: multi-block grid with a partial last block. ---
    y_shape = (2, 64, 64, 48)   # 393216 elems -> (192, 2048) slab, grid of 2
    f_b = jax.random.normal(k3, y_shape, dtype=jnp.float32)
    concat_b = jax.random.normal(k4, y_shape, dtype=jnp.float32)
    out_b = jax.block_until_ready(skip_parameter(f_b, concat_b, skip_value))
    ref_b = f_b + skip_value[0] * concat_b
    assert out_b.shape == y_shape
    assert jnp.allclose(out_b, ref_b, atol=1e-6, rtol=1e-6)

    print("KERNEL_OK")
</pallas_src>

<mosaic_0001>
module attributes {stable_mosaic.version = 11 : i64} {
  func.func @_skip_kernel(%arg0: i32, %arg1: memref<1xf32, #tpu.memory_space<smem>>, %arg2: memref<1x2048xf32, #tpu.memory_space<vmem>>, %arg3: memref<1x2048xf32, #tpu.memory_space<vmem>>, %arg4: memref<1x2048xf32, #tpu.memory_space<vmem>>) attributes {dimension_semantics = [#tpu.dimension_semantics<parallel>], iteration_bounds = array<i64: 1>, scalar_prefetch = 0 : i64, scratch_operands = 0 : i64, tpu.core_type = #tpu.core_type<tc>, window_params = [{transform_indices = @transform_0, window_bounds = array<i64: 1>}, {transform_indices = @transform_1, window_bounds = array<i64: 1, 2048>}, {transform_indices = @transform_2, window_bounds = array<i64: 1, 2048>}, {transform_indices = @transform_3, window_bounds = array<i64: 1, 2048>}]} {
    %c0 = arith.constant 0 : index
    %0 = memref.load %arg1[%c0] : memref<1xf32, #tpu.memory_space<smem>>
    %c0_0 = arith.constant 0 : index
    %c0_1 = arith.constant 0 : index
    %1 = vector.load %arg2[%c0_0, %c0_1] : memref<1x2048xf32, #tpu.memory_space<vmem>>, vector<1x2048xf32>
    %c0_2 = arith.constant 0 : index
    %c0_3 = arith.constant 0 : index
    %2 = vector.load %arg3[%c0_2, %c0_3] : memref<1x2048xf32, #tpu.memory_space<vmem>>, vector<1x2048xf32>
    %3 = vector.broadcast %0 : f32 to vector<1x2048xf32>
    %4 = arith.mulf %3, %2 : vector<1x2048xf32>
    %5 = arith.addf %1, %4 : vector<1x2048xf32>
    %c0_4 = arith.constant 0 : index
    %c0_5 = arith.constant 0 : index
    %6 = vector.load %arg4[%c0_4, %c0_5] : memref<1x2048xf32, #tpu.memory_space<vmem>>, vector<1x2048xf32>
    tpu.vector_store %arg4[%c0_4, %c0_5], %5 {strides = array<i32>} : memref<1x2048xf32, #tpu.memory_space<vmem>>, vector<1x2048xf32>,
    return
  }
  func.func @transform_0(%arg0: i32) -> i32 {
    %c0_i32 = arith.constant 0 : i32
    %c0_i32_0 = arith.constant 0 : i32
    return %c0_i32 : i32
  }
  func.func @transform_1(%arg0: i32) -> (i32, i32) {
    %c0_i32 = arith.constant 0 : i32
    %c0_i32_0 = arith.constant 0 : i32
    return %arg0, %c0_i32 : i32, i32
  }
  func.func @transform_2(%arg0: i32) -> (i32, i32) {
    %c0_i32 = arith.constant 0 : i32
    %c0_i32_0 = arith.constant 0 : i32
    return %arg0, %c0_i32 : i32, i32
  }
  func.func @transform_3(%arg0: i32) -> (i32, i32) {
    %c0_i32 = arith.constant 0 : i32
    %c0_i32_0 = arith.constant 0 : i32
    return %arg0, %c0_i32 : i32, i32
  }
}

</mosaic_0001>

<bundles_post_ra>
// kernel: tpu_custom_call.1
= control target key start
LH: loop header
LB: loop body
LE: loop exit
PB: predicated region body
PF: predicated region fallthrough
CT: control target
= control target key end

     0   :  { %9 = vsyncpa [#allocation4], 0  ;;  %s172_s0 = inlined_call_operand.<no memory space> [shape: f32[1], index: 0, kind: input, shape index: {}]   ;;  %s173_s1 = inlined_call_operand.hbm [shape: f32[1,2048], index: 1, kind: input, shape index: {}]   ;;  %s174_s2 = inlined_call_operand.hbm [shape: f32[1,2048], index: 2, kind: input, shape index: {}]   ;;  %s175_s3 = inlined_call_operand.hbm [shape: f32[1,2048], index: 3, kind: output, shape index: {}]  }
   0x1   :  { %10 = vsyncpa [#allocation7], 0 }
   0x2   :  { %11 = vsyncpa [#allocation5], 0  ;;  %s137_s12 = smov [#allocation3]   ;;  %s138_s14 = smov [#allocation6]  }
   0x3   :  { %s20_s13 = sshll.u32 %s137_s12, 4  ;;  %s30_s15 = sshll.u32 %s138_s14, 4  ;;  %s21_s13 = int_to_ptr.vmem [resolvable:$true] %s20_s13  ;;  %s31_s15 = int_to_ptr.vmem [resolvable:$true] %s30_s15 }
   0x4   :  { %s79_s16 = scalar_lea.vmem %s21_s13, 256  ;;  %p84_p1 = scmp.lt.s32.totalorder %s21_s13, %s21_s13 }
   0x5   :  { %p80_p0 = scmp.ne.s32.totalorder %s21_s13, %s79_s16  ;;  %p85_p2 = scmp.lt.s32.totalorder %s79_s16, %s79_s16 }
   0x7   :  { %p86_p3 = por %p85_p2, %p84_p1 }
   0x9   :  { %p87_p4 = pnand %p86_p3, %p80_p0 }
   0xb   :  { %90 = shalt.err (!%p87_p4)
}
   0xc   :  { %23 = dma.hbm_to_vmem [thread:$0]  %s173_s1, 256, %s21_s13, [#allocation4]  }
   0xd   :  { %s99_s19 = scalar_lea.vmem %s31_s15, 256  ;;  %p104_p6 = scmp.lt.s32.totalorder %s31_s15, %s31_s15 }
   0xe   :  { %p100_p5 = scmp.ne.s32.totalorder %s31_s15, %s99_s19  ;;  %p105_p7 = scmp.lt.s32.totalorder %s99_s19, %s99_s19 }
  0x10   :  { %p106_p8 = por %p105_p7, %p104_p6 }
  0x12   :  { %p107_p9 = pnand %p106_p8, %p100_p5 }
  0x14   :  { %110 = shalt.err (!%p107_p9)
}
  0x15   :  { %33 = dma.hbm_to_vmem [thread:$0]  %s174_s2, 256, %s31_s15, [#allocation7]  }
  0x16   :  { %131 = dma.done.wait [#allocation4], 256  }
  0x17   :  { %132 = vsyncadd [#allocation4], 4294967040 }
  0x18   :  { %133 = dma.done.wait [#allocation7], 256  }
  0x19   :  { %134 = vsyncadd [#allocation7], 4294967040  ;;  %v45_v0 = vstv %s172_s0  ;;  %v41_v1 = vld [vmem:[#allocation3] sm:$0xff]  ;;  %v43_v2 = vld [vmem:[#allocation6] sm:$0xff]  ;;  %s139_s1 = smov [#allocation8]  }
  0x1a   :  { %v46_v3 = vmul.f32 %v45_v0, %v43_v2  ;;  %v42_v4 = vld [vmem:[#allocation3 + $0x8] sm:$0xff]  ;;  %v44_v5 = vld [vmem:[#allocation6 + $0x8] sm:$0xff]  ;;  %s58_s24 = sshll.u32 %s139_s1, 4  ;;  %s59_s24 = int_to_ptr.vmem [resolvable:$true] %s58_s24 }
  0x1b   :  { %v47_v6 = vmul.f32 %v45_v0, %v44_v5  ;;  %s111_s2 = scalar_lea.vmem %s59_s24, 256  ;;  %p116_p11 = scmp.lt.s32.totalorder %s59_s24, %s59_s24 }
  0x1c   :  { %v48_v7 = vadd.f32 %v46_v3, %v41_v1  ;;  %p112_p10 = scmp.ne.s32.totalorder %s59_s24, %s111_s2  ;;  %p117_p12 = scmp.lt.s32.totalorder %s111_s2, %s111_s2 }
  0x1d   :  { %v49_v8 = vadd.f32 %v47_v6, %v42_v4 }
  0x1e   :  { %50 = vst [vmem:[#allocation8] sm:$0xff] %v48_v7  ;;  %p118_p13 = por %p117_p12, %p116_p11 }
  0x1f   :  { %51 = vst [vmem:[#allocation8 + $0x8] sm:$0xff] %v49_v8 }
  0x20   :  { %p119_p0 = pnand %p118_p13, %p112_p10 }
  0x22   :  { %122 = shalt.err (!%p119_p0)
}
  0x23   :  { %61 = dma.vmem_to_hbm [thread:$0]  %s59_s24, 256, %s175_s3, [#allocation5]  }
  0x24   :  { %135 = dma.done.wait [#allocation5], 256  }
  0x25   :  { %136 = vsyncadd [#allocation5], 4294967040 }
  0x26   :  { %65 = vsyncpa [#allocation4], 1 }
  0x27   :  { %66 = vsyncpa [#allocation7], 1 }
  0x28   :  { %67 = vsyncpa [#allocation5], 1 }

</bundles_post_ra>
